<compile_context>
chip_gen: v7x
topology: tpu7x:2x2x1
jax: 0.10.0
libtpu: 0.0.40
codegen_flags: <defaults>
</compile_context>

<pallas_src>
import functools

import jax
import jax.numpy as jnp
from jax.experimental import pallas as pl
from jax.experimental.pallas import tpu as pltpu

_HIGHEST = jax.lax.Precision.HIGHEST
_LANES = 128


def _round_up(x, m):
    return (x + m - 1) // m * m


def _mxu_target_rows():
    """Generation-aware target for the first matmul's M dimension (G*h)."""
    try:
        kind = jax.devices()[0].device_kind.lower()
    except Exception:
        return 256
    for tag in ("v2", "v3", "v4", "v5 lite", "v5e", "v5lite"):
        if tag in kind:
            return 128          # 128x128 MXU tiles
    return 256                  # v6e / v7x: 256x256 MXU tiles


def pick_images_per_block(B, h, *, target_m=None, max_g=8):
    """Images per grid block G.

    * keyed to the FIRST matmul's M = G*h (MXU row fill, generation aware)
    * hard cap max_g: lcat is block-diagonal over G, so its FLOPs and VMEM
      grow ~G^2 while useful work only grows ~G
    * capped to B//2 so the 'parallel' grid axis has >= 2 blocks and can be
      sharded across v7x's two TensorCores (no cost on single-TC v5e/v6e)
    Batches that are not a multiple of G are zero-padded by the wrapper
    instead of dropping to G=1.
    """
    if target_m is None:
        target_m = _mxu_target_rows()
    g = max(1, min(B, max(1, target_m // max(h, 1)), max_g))
    if B >= 2:
        g = max(1, min(g, B // 2))
    return g


def _bilinear_matrix(dst, src):
    """PyTorch F.interpolate(mode='bilinear', align_corners=False) along one
    axis, expressed as a (dst, src) interpolation matrix (out = M @ in)."""
    d = jnp.arange(dst, dtype=jnp.float32)
    scale = src / dst
    s = jnp.maximum((d + 0.5) * scale - 0.5, 0.0)
    i0 = jnp.clip(jnp.floor(s).astype(jnp.int32), 0, src - 1)
    i1 = jnp.clip(i0 + 1, 0, src - 1)
    w1 = s - i0.astype(jnp.float32)
    w0 = 1.0 - w1
    m = jnp.zeros((dst, src), jnp.float32)
    rows = jnp.arange(dst)
    m = m.at[rows, i0].add(w0)
    m = m.at[rows, i1].add(w1)
    return m


def pack_spau_params(params, H, W, h, w, images_per_block):
    """One-time weight packing (hoisted out of the per-call forward path).

    Returns:
      rcomb_cat : (Kpad, 3*W*C)  column interp + dx taps + fused 1x1 per dy;
                                 K zero-padded to a multiple of 128 lanes.
      lcat3     : (3, G*H, G*h)  per-dy row interp (conv zero-pad rows baked
                                 in), block-diagonal over the G images/block.
      bias      : (1, W*C)       fused bias (b3 @ W1 + b1), tiled over W.
    """
    w3, b3, w1, b1 = params                        # OIHW, (C,), OIHW, (C,)
    C = w3.shape[0]

    # ---- fuse the 1x1 conv into the 3x3 taps (exact) ----------------------
    w3_io = jnp.transpose(w3, (2, 3, 1, 0))        # (3, 3, Cin, Cmid)
    w1_io = w1[:, :, 0, 0].T                       # (Cmid, Cout)
    wf = jnp.einsum('yxim,mc->yxic', w3_io, w1_io, precision=_HIGHEST)
    bf = jnp.matmul(b3, w1_io, precision=_HIGHEST) + b1           # (C,)

    # ---- separable bilinear matrices, conv zero-padding rows baked in -----
    l_pad = jnp.pad(_bilinear_matrix(H, h), ((1, 1), (0, 0)))     # (H+2, h)
    r_pad = jnp.pad(_bilinear_matrix(W, w), ((1, 1), (0, 0)))     # (W+2, w)
    rkt = jnp.kron(r_pad, jnp.eye(C, dtype=jnp.float32)).T        # (w*C,(W+2)*C)

    # ---- fold column interp + dx taps + fused 1x1 into Rcomb[dy] ----------
    eye_w = jnp.eye(W, dtype=jnp.float32)
    rcomb = []
    for dy in range(3):
        acc = jnp.zeros((w * C, W * C), jnp.float32)
        for dx in range(3):
            acc = acc + jnp.matmul(rkt[:, dx * C:(dx + W) * C],
                                   jnp.kron(eye_w, wf[dy, dx]),
                                   precision=_HIGHEST)
        rcomb.append(acc)
    rcomb_cat = jnp.concatenate(rcomb, axis=1)                    # (w*C, 3*W*C)

    # Pad K to a full 128-lane width (matching zero columns are appended to
    # fin2d by the wrapper) -> unmasked loads / full vregs on matmul #1.
    k_pad = _round_up(w * C, _LANES)
    if k_pad != w * C:
        rcomb_cat = jnp.pad(rcomb_cat, ((0, k_pad - w * C), (0, 0)))

    # ---- per-dy row interp, block-diagonal over the images of a block -----
    G = images_per_block
    eye_g = jnp.eye(G, dtype=jnp.float32)
    lcat3 = jnp.stack(
        [jnp.kron(eye_g, l_pad[dy:dy + H, :]) for dy in range(3)], axis=0)

    bias = jnp.tile(bf, W)[None, :]                               # (1, W*C)
    return rcomb_cat, lcat3, bias


def _spau_kernel(fin_ref, rcomb_ref, lcat_ref, bias_ref, out_ref):
    wc = out_ref.shape[1]
    # MXU pass #1: column resize + dx taps + fused 1x1 for all three dy rows.
    t = jnp.dot(fin_ref[...], rcomb_ref[...],
                preferred_element_type=jnp.float32)               # (G*h, 3*W*C)
    # MXU pass #2: per-dy row interp, accumulated.  The dy slices of t are
    # 128-lane-aligned free views (no restack/concat copy); lcat_ref[dy] is a
    # leading-axis view of the resident (3, G*H, G*h) weight.
    acc = jnp.dot(lcat_ref[0], t[:, :wc], preferred_element_type=jnp.float32)
    acc = acc + jnp.dot(lcat_ref[1], t[:, wc:2 * wc],
                        preferred_element_type=jnp.float32)
    acc = acc + jnp.dot(lcat_ref[2], t[:, 2 * wc:],
                        preferred_element_type=jnp.float32)
    out_ref[...] = jnp.maximum(acc + bias_ref[...], 0.0).astype(out_ref.dtype)


def _spau_call(fin2d, rcomb_cat, lcat3, bias, *, G, H, h, W, C):
    """Run the kernel on the lane-padded (Bp*h, Kpad) NHWC slab; returns the
    (Bp*H, W*C) output slab.  Callers that already hold this layout should
    use this entry point and skip the NCHW transposes in spau_forward."""
    m_rows, k_pad = fin2d.shape
    bp = m_rows // h
    assert bp * h == m_rows and bp % G == 0
    num_blocks = bp // G
    wc = W * C
    itemsize = 4

    # VMEM budget derived from the actual blocks: fin/out are double-buffered
    # by the pipeline, the grid-invariant weights are single-buffered, plus
    # the in-kernel temporaries and generous slack.
    blk_bytes = (2 * G * h * k_pad                      # fin block x2
                 + rcomb_cat.size + lcat3.size + bias.size
                 + 2 * G * H * wc                       # out block x2
                 + G * h * 3 * wc + G * H * wc          # t and acc temporaries
                 ) * itemsize
    vmem_limit = int(min(max(2 * blk_bytes + (4 << 20), 8 << 20), 64 << 20))

    flops = (2 * m_rows * k_pad * (3 * wc)              # matmul #1
             + 2 * 3 * bp * H * (G * h) * wc)           # matmul #2 (3 dy dots)
    bytes_accessed = (fin2d.size + rcomb_cat.size + lcat3.size + bias.size
                      + bp * H * wc) * itemsize

    return pl.pallas_call(
        _spau_kernel,
        out_shape=jax.ShapeDtypeStruct((bp * H, wc), jnp.float32),
        grid=(num_blocks,),
        in_specs=[
            pl.BlockSpec((G * h, k_pad), lambda i: (i, 0)),
            # Grid-invariant weights: constant index_map, single-buffered so
            # they are fetched once and do not burn double-buffer VMEM (v7x).
            pl.BlockSpec(rcomb_cat.shape, lambda i: (0, 0),
                         pipeline_mode=pl.Buffered(1)),
            pl.BlockSpec(lcat3.shape, lambda i: (0, 0, 0),
                         pipeline_mode=pl.Buffered(1)),
            pl.BlockSpec(bias.shape, lambda i: (0, 0),
                         pipeline_mode=pl.Buffered(1)),
        ],
        out_specs=pl.BlockSpec((G * H, wc), lambda i: (i, 0)),
        compiler_params=pltpu.CompilerParams(
            dimension_semantics=("parallel",),
            vmem_limit_bytes=vmem_limit),
        cost_estimate=pl.CostEstimate(flops=flops, transcendentals=0,
                                      bytes_accessed=bytes_accessed),
    )(fin2d, rcomb_cat, lcat3, bias)


@functools.partial(jax.jit, static_argnames=("images_per_block",))
def spau_forward(fin, x, rcomb_cat, lcat3, bias, *, images_per_block):
    """SpaU.forward(fin, x) with pre-packed weights.  NCHW f32 tensors."""
    B, C, h, w = fin.shape
    H, W = x.shape[2], x.shape[3]
    G = images_per_block
    k_pad = rcomb_cat.shape[0]
    assert k_pad == _round_up(w * C, _LANES)
    assert rcomb_cat.shape == (k_pad, 3 * W * C)
    assert lcat3.shape == (3, G * H, G * h)
    assert bias.shape == (1, W * C)

    # Zero-pad the batch up to a multiple of G (keeps MXU fill instead of
    # falling back to a G=1 / M=h configuration).
    b_pad = _round_up(B, G)
    if b_pad != B:
        fin = jnp.pad(fin, ((0, b_pad - B), (0, 0), (0, 0), (0, 0)))

    # NCHW -> flattened NHWC slab: rows = batch*h, cols = w*C (lane-padded).
    fin2d = jnp.transpose(fin, (0, 2, 3, 1)).reshape(b_pad * h, w * C)
    if k_pad != w * C:
        fin2d = jnp.pad(fin2d, ((0, 0), (0, k_pad - w * C)))

    out2d = _spau_call(fin2d, rcomb_cat, lcat3, bias, G=G, H=H, h=h, W=W, C=C)
    out = jnp.transpose(out2d.reshape(b_pad, H, W, C), (0, 3, 1, 2))
    return out[:B]


def _reference_spau(fin, x, params):
    """Pure-JAX reference of the PyTorch SpaU forward (NCHW)."""
    w3, b3, w1, b1 = params
    H, W = x.shape[2], x.shape[3]

    L = _bilinear_matrix(H, fin.shape[2])
    R = _bilinear_matrix(W, fin.shape[3])
    up = jnp.einsum('Hh,bchw,Ww->bcHW', L, fin, R, precision=_HIGHEST)

    def conv(inp, wt, bias, pad):
        out = jax.lax.conv_general_dilated(
            inp, wt, window_strides=(1, 1),
            padding=[(pad, pad), (pad, pad)],
            dimension_numbers=('NCHW', 'OIHW', 'NCHW'),
            precision=_HIGHEST)
        return out + bias[None, :, None, None]

    return jax.nn.relu(conv(conv(up, w3, b3, 1), w1, b1, 0))


def init_params(key, C):
    """Deterministic Conv2d-style (kaiming-uniform-ish) parameter init."""
    ks = jax.random.split(key, 4)

    def u(k, shape, fan_in):
        bound = 1.0 / (fan_in ** 0.5)
        return jax.random.uniform(k, shape, jnp.float32, -bound, bound)

    w3 = u(ks[0], (C, C, 3, 3), C * 9)
    b3 = u(ks[1], (C,), C * 9)
    w1 = u(ks[2], (C, C, 1, 1), C)
    b1 = u(ks[3], (C,), C)
    return (w3, b3, w1, b1)


if __name__ == "__main__":
    key = jax.random.PRNGKey(0)
    k_fin, k_x, k_p = jax.random.split(key, 3)

    B, C_out, C_x = 2, 8, 4       # outband=8; x only supplies the target H,W
    H = W = 16                    # full-resolution spatial size (from x)
    h = w = 8                     # low-resolution fin spatial size

    fin = jax.random.normal(k_fin, (B, C_out, h, w), jnp.float32)
    x = jax.random.normal(k_x, (B, C_x, H, W), jnp.float32)
    params = init_params(k_p, C_out)

    # One-time weight packing (kept out of the per-call forward path).
    G = pick_images_per_block(B, h)
    rcomb_cat, lcat3, bias = pack_spau_params(params, H, W, h, w, G)
    rcomb_cat, lcat3, bias = jax.block_until_ready((rcomb_cat, lcat3, bias))

    out = spau_forward(fin, x, rcomb_cat, lcat3, bias, images_per_block=G)
    out = jax.block_until_ready(out)

    ref = _reference_spau(fin, x, params)
    assert out.shape == ref.shape == (B, C_out, H, W)
    max_err = float(jnp.max(jnp.abs(out - ref)))
    if not (max_err < 1e-4):
        raise AssertionError(f"kernel/reference mismatch: max abs err {max_err}")

    print("KERNEL_OK")
</pallas_src>

<mosaic_0001>
module attributes {stable_mosaic.version = 11 : i64} {
  func.func @_spau_kernel(%arg0: i32, %arg1: memref<8x128xf32, #tpu.memory_space<vmem>>, %arg2: memref<128x384xf32, #tpu.memory_space<vmem>>, %arg3: memref<3x16x8xf32, #tpu.memory_space<vmem>>, %arg4: memref<1x128xf32, #tpu.memory_space<vmem>>, %arg5: memref<16x128xf32, #tpu.memory_space<vmem>>) attributes {dimension_semantics = [#tpu.dimension_semantics<parallel>], iteration_bounds = array<i64: 2>, scalar_prefetch = 0 : i64, scratch_operands = 0 : i64, tpu.core_type = #tpu.core_type<tc>, window_params = [{transform_indices = @transform_0, window_bounds = array<i64: 8, 128>}, {pipeline_mode = #tpu.pipeline_mode<synchronous>, transform_indices = @transform_1, window_bounds = array<i64: 128, 384>}, {pipeline_mode = #tpu.pipeline_mode<synchronous>, transform_indices = @transform_2, window_bounds = array<i64: 3, 16, 8>}, {pipeline_mode = #tpu.pipeline_mode<synchronous>, transform_indices = @transform_3, window_bounds = array<i64: 1, 128>}, {transform_indices = @transform_4, window_bounds = array<i64: 16, 128>}]} {
    %c0 = arith.constant 0 : index
    %c0_0 = arith.constant 0 : index
    %0 = vector.load %arg1[%c0, %c0_0] : memref<8x128xf32, #tpu.memory_space<vmem>>, vector<8x128xf32>
    %c0_1 = arith.constant 0 : index
    %c0_2 = arith.constant 0 : index
    %1 = vector.load %arg2[%c0_1, %c0_2] : memref<128x384xf32, #tpu.memory_space<vmem>>, vector<128x384xf32>
    %cst = arith.constant dense<0.000000e+00> : vector<8x384xf32>
    %2 = tpu.matmul %0, %1, %cst {dimension_numbers = #tpu.dot_dimension_numbers<[1], [0], [0], [1], [0, 0, 1, 1], [], []>} : vector<8x128xf32>, vector<128x384xf32>, vector<8x384xf32> -> vector<8x384xf32>
    %c0_3 = arith.constant 0 : index
    %c0_4 = arith.constant 0 : index
    %c0_5 = arith.constant 0 : index
    %3 = vector.load %arg3[%c0_3, %c0_4, %c0_5] : memref<3x16x8xf32, #tpu.memory_space<vmem>>, vector<1x16x8xf32>
    %4 = vector.shape_cast %3 : vector<1x16x8xf32> to vector<16x8xf32>
    %5 = vector.extract_strided_slice %2 {offsets = [0, 0], sizes = [8, 128], strides = [1, 1]} : vector<8x384xf32> to vector<8x128xf32>
    %cst_6 = arith.constant dense<0.000000e+00> : vector<16x128xf32>
    %6 = tpu.matmul %4, %5, %cst_6 {dimension_numbers = #tpu.dot_dimension_numbers<[1], [0], [0], [1], [0, 0, 1, 1], [], []>} : vector<16x8xf32>, vector<8x128xf32>, vector<16x128xf32> -> vector<16x128xf32>
    %c1 = arith.constant 1 : index
    %c0_7 = arith.constant 0 : index
    %c0_8 = arith.constant 0 : index
    %7 = vector.load %arg3[%c1, %c0_7, %c0_8] : memref<3x16x8xf32, #tpu.memory_space<vmem>>, vector<1x16x8xf32>
    %8 = vector.shape_cast %7 : vector<1x16x8xf32> to vector<16x8xf32>
    %9 = vector.extract_strided_slice %2 {offsets = [0, 128], sizes = [8, 128], strides = [1, 1]} : vector<8x384xf32> to vector<8x128xf32>
    %cst_9 = arith.constant dense<0.000000e+00> : vector<16x128xf32>
    %10 = tpu.matmul %8, %9, %cst_9 {dimension_numbers = #tpu.dot_dimension_numbers<[1], [0], [0], [1], [0, 0, 1, 1], [], []>} : vector<16x8xf32>, vector<8x128xf32>, vector<16x128xf32> -> vector<16x128xf32>
    %11 = arith.addf %6, %10 : vector<16x128xf32>
    %c2 = arith.constant 2 : index
    %c0_10 = arith.constant 0 : index
    %c0_11 = arith.constant 0 : index
    %12 = vector.load %arg3[%c2, %c0_10, %c0_11] : memref<3x16x8xf32, #tpu.memory_space<vmem>>, vector<1x16x8xf32>
    %13 = vector.shape_cast %12 : vector<1x16x8xf32> to vector<16x8xf32>
    %14 = vector.extract_strided_slice %2 {offsets = [0, 256], sizes = [8, 128], strides = [1, 1]} : vector<8x384xf32> to vector<8x128xf32>
    %cst_12 = arith.constant dense<0.000000e+00> : vector<16x128xf32>
    %15 = tpu.matmul %13, %14, %cst_12 {dimension_numbers = #tpu.dot_dimension_numbers<[1], [0], [0], [1], [0, 0, 1, 1], [], []>} : vector<16x8xf32>, vector<8x128xf32>, vector<16x128xf32> -> vector<16x128xf32>
    %16 = arith.addf %11, %15 : vector<16x128xf32>
    %c0_13 = arith.constant 0 : index
    %c0_14 = arith.constant 0 : index
    %17 = vector.load %arg4[%c0_13, %c0_14] : memref<1x128xf32, #tpu.memory_space<vmem>>, vector<1x128xf32>
    %18 = vector.broadcast %17 : vector<1x128xf32> to vector<16x128xf32>
    %19 = arith.addf %16, %18 : vector<16x128xf32>
    %cst_15 = arith.constant 0.000000e+00 : f32
    %20 = vector.broadcast %cst_15 : f32 to vector<16x128xf32>
    %21 = arith.maximumf %19, %20 : vector<16x128xf32>
    %c0_16 = arith.constant 0 : index
    %c0_17 = arith.constant 0 : index
    %22 = vector.load %arg5[%c0_16, %c0_17] : memref<16x128xf32, #tpu.memory_space<vmem>>, vector<16x128xf32>
    tpu.vector_store %arg5[%c0_16, %c0_17], %21 {strides = array<i32>} : memref<16x128xf32, #tpu.memory_space<vmem>>, vector<16x128xf32>,
    return
  }
  func.func @transform_0(%arg0: i32) -> (i32, i32) {
    %c0_i32 = arith.constant 0 : i32
    %c0_i32_0 = arith.constant 0 : i32
    return %arg0, %c0_i32 : i32, i32
  }
  func.func @transform_1(%arg0: i32) -> (i32, i32) {
    %c0_i32 = arith.constant 0 : i32
    %c0_i32_0 = arith.constant 0 : i32
    %c0_i32_1 = arith.constant 0 : i32
    return %c0_i32, %c0_i32_0 : i32, i32
  }
  func.func @transform_2(%arg0: i32) -> (i32, i32, i32) {
    %c0_i32 = arith.constant 0 : i32
    %c0_i32_0 = arith.constant 0 : i32
    %c0_i32_1 = arith.constant 0 : i32
    %c0_i32_2 = arith.constant 0 : i32
    return %c0_i32, %c0_i32_0, %c0_i32_1 : i32, i32, i32
  }
  func.func @transform_3(%arg0: i32) -> (i32, i32) {
    %c0_i32 = arith.constant 0 : i32
    %c0_i32_0 = arith.constant 0 : i32
    %c0_i32_1 = arith.constant 0 : i32
    return %c0_i32, %c0_i32_0 : i32, i32
  }
  func.func @transform_4(%arg0: i32) -> (i32, i32) {
    %c0_i32 = arith.constant 0 : i32
    %c0_i32_0 = arith.constant 0 : i32
    return %arg0, %c0_i32 : i32, i32
  }
}

</mosaic_0001>

<bundles_post_ra>
// kernel: spau_forward.1
= control target key start
LH: loop header
LB: loop body
LE: loop exit
PB: predicated region body
PF: predicated region fallthrough
CT: control target
= control target key end

     0   :  { %s913_s15 = smov 0   ;;  %s1116_s0 = inlined_call_operand.vmem [shape: f32[16,128], index: 0, kind: input, shape index: {}]   ;;  %s1117_s1 = inlined_call_operand.vmem [shape: f32[128,384], index: 1, kind: input, shape index: {}]   ;;  %s1118_s2 = inlined_call_operand.vmem [shape: f32[3,16,8], index: 2, kind: input, shape index: {}]   ;;  %s1119_s3 = inlined_call_operand.vmem [shape: f32[1,128], index: 3, kind: input, shape index: {}]   ;;  %s1120_s4 = inlined_call_operand.vmem [shape: f32[32,128], index: 4, kind: output, shape index: {}]  }
   0x1 LB: > { %s919_s16 = sadd.s32 4294967295, %s883_s15   ;;  %p713_p0 = scmp.ge.s32.totalorder %s883_s15, 1  ;;  %s883_s15 = sphi %s913_s15, %s14_s15  }
   0x2   : > { %p161_p1 = scmp.lt.s32.totalorder %s883_s15, 3 }
   0x4   : > { %p162_p2 = pnand %p713_p0, %p161_p1 }
   0x5   : > { %v198_v0 = vld [vmem:[%s1117_s1 + $0x8] sm:$0xff] (!%p162_p2)  ;;  %v201_v1 = vld [vmem:[%s1117_s1 + $0x20] sm:$0xff] (!%p162_p2)  ;;  %v200_v4 = vld [vmem:[%s1117_s1 + $0x18] sm:$0xff] (!%p162_p2)  ;;  %v885_v5 = vmov (!%p162_p2), 0.0|0.0   ;;  %v886_v8 = vmov (!%p162_p2), 0.0   ;;  %vm887_vm0 = vmmov (!%p162_p2), 0  }
   0x6   : > { %165 = sbr.rel (%p162_p2) target bundleno = 482 (0x1e2), region = 36  ;;  %v197_v2 = vld [vmem:[%s1117_s1] sm:$0xff] (!%p162_p2)  ;;  %v806_v3 = vpack.c.bf16 (!%p162_p2), %v201_v1, %v198_v0  ;;  %838 = vmatprep.subr.bf16.mxu1 (!%p162_p2), %v885_v5  ;;  %v204_v6 = vld [vmem:[%s1117_s1 + $0x38] sm:$0xff] (!%p162_p2)  ;;  %v207_v7 = vld [vmem:[%s1117_s1 + $0x50] sm:$0xff] (!%p162_p2)  ;;  %309 = vmatprep.mubr.f32.mxu0 (!%p162_p2), %v886_v8  ;;  %p186_p3 = scmp.lt.s32.totalorder (!%p162_p2), %s919_s16, 1  ;;  %vm391_vm1 = vcmask (!%p162_p2), 64512  }
   0x7   : > { %v808_v9 = vpack.c.bf16 (!%p162_p2), %v200_v4, %v197_v2  ;;  %v810_v10 = vpack.c.bf16 (!%p162_p2), %v207_v7, %v204_v6  ;;  %v199_v11 = vld [vmem:[%s1117_s1 + $0x10] sm:$0xff] (!%p162_p2)  ;;  %v202_v12 = vld [vmem:[%s1117_s1 + $0x28] sm:$0xff] (!%p162_p2)  ;;  %788 = vmatprep.mubr.msk.f32.mxu1 (!%p162_p2), %vm887_vm0, %v886_v8  ;;  %v213_v17 = vld [vmem:[%s1117_s1 + $0x80] sm:$0xff] (!%p162_p2)  ;;  %s715_s8 = sshll.u32 (!%p162_p2), %s919_s16, 1 }
   0x8   : > { %v203_v13 = vld [vmem:[%s1117_s1 + $0x30] sm:$0xff] (!%p162_p2)  ;;  %807 = vmatprep.subr.bf16.mxu0 (!%p162_p2), %v806_v3  ;;  %v839_v14 = vpack.c.bf16 (!%p162_p2), %v202_v12, %v199_v11  ;;  %v206_v15 = vld [vmem:[%s1117_s1 + $0x48] sm:$0xff] (!%p162_p2)  ;;  %v205_v19 = vld [vmem:[%s1117_s1 + $0x40] sm:$0xff] (!%p162_p2)  ;;  %p191_p4 = scmp.lt.s32.totalorder (!%p162_p2), %s715_s8, 3 }
   0x9   : > { %v210_v16 = vld [vmem:[%s1117_s1 + $0x68] sm:$0xff] (!%p162_p2)  ;;  %809 = vmatpush1.bf16.msra.mxu0 (!%p162_p2), %v808_v9  ;;  %v812_v18 = vpack.c.bf16 (!%p162_p2), %v206_v15, %v203_v13  ;;  %v208_v20 = vld [vmem:[%s1117_s1 + $0x58] sm:$0xff] (!%p162_p2)  ;;  %v209_v23 = vld [vmem:[%s1117_s1 + $0x60] sm:$0xff] (!%p162_p2) }
   0xa   : > { %811 = vmatprep.subr.bf16.mxu0 (!%p162_p2), %v810_v10  ;;  %840 = vmatpush3.bf16.msra.mxu1 (!%p162_p2), %v839_v14  ;;  %v814_v21 = vpack.c.bf16 (!%p162_p2), %v213_v17, %v210_v16  ;;  %v842_v22 = vpack.c.bf16 (!%p162_p2), %v208_v20, %v205_v19  ;;  %v212_v24 = vld [vmem:[%s1117_s1 + $0x78] sm:$0xff] (!%p162_p2)  ;;  %v219_v26 = vld [vmem:[%s1117_s1 + $0xb0] sm:$0xff] (!%p162_p2)  ;;  %v214_v28 = vld [vmem:[%s1117_s1 + $0x88] sm:$0xff] (!%p162_p2) }
   0xb   : > { %v216_v25 = vld [vmem:[%s1117_s1 + $0x98] sm:$0xff] (!%p162_p2)  ;;  %841 = vmatprep.subr.bf16.mxu1 (!%p162_p2), %v885_v5  ;;  %v211_v27 = vld [vmem:[%s1117_s1 + $0x70] sm:$0xff] (!%p162_p2)  ;;  %v816_v29 = vpack.c.bf16 (!%p162_p2), %v212_v24, %v209_v23  ;;  %v218_v33 = vld [vmem:[%s1117_s1 + $0xa8] sm:$0xff] (!%p162_p2) }
   0xc   : > { %v818_v30 = vpack.c.bf16 (!%p162_p2), %v219_v26, %v216_v25  ;;  %v845_v31 = vpack.c.bf16 (!%p162_p2), %v214_v28, %v211_v27  ;;  %v215_v32 = vld [vmem:[%s1117_s1 + $0x90] sm:$0xff] (!%p162_p2)  ;;  %v222_v34 = vld [vmem:[%s1117_s1 + $0xc8] sm:$0xff] (!%p162_p2)  ;;  %v225_v35 = vld [vmem:[%s1117_s1 + $0xe0] sm:$0xff] (!%p162_p2) }
   0xd   : > { %813 = vmatpush1.bf16.msra.mxu0 %v812_v18  ;;  %v217_v36 = vld [vmem:[%s1117_s1 + $0xa0] sm:$0xff]  ;;  %v220_v37 = vld [vmem:[%s1117_s1 + $0xb8] sm:$0xff]  ;;  %v820_v38 = vpack.c.bf16 %v218_v33, %v215_v32  ;;  %v822_v39 = vpack.c.bf16 %v225_v35, %v222_v34  ;;  %v231_v44 = vld [vmem:[%s1117_s1 + $0x110] sm:$0xff]  ;;  %s187_s7 = scalar_select %p186_p3, %s919_s16, 1 }
   0xe   : > { %815 = vmatprep.subr.bf16.mxu0 %v814_v21  ;;  %843 = vmatpush3.bf16.msra.mxu1 %v842_v22  ;;  %v848_v40 = vpack.c.bf16 %v220_v37, %v217_v36  ;;  %v221_v41 = vld [vmem:[%s1117_s1 + $0xc0] sm:$0xff]  ;;  %v224_v42 = vld [vmem:[%s1117_s1 + $0xd8] sm:$0xff]  ;;  %v223_v45 = vld [vmem:[%s1117_s1 + $0xd0] sm:$0xff]  ;;  %s1122_s8 = smov (!%p191_p4, %s715_s8), 3 }
   0xf   : > { %844 = vmatprep.subr.bf16.mxu1 %v885_v5  ;;  %v228_v43 = vld [vmem:[%s1117_s1 + $0xf8] sm:$0xff]  ;;  %v226_v46 = vld [vmem:[%s1117_s1 + $0xe8] sm:$0xff]  ;;  %v824_v47 = vpack.c.bf16 %v224_v42, %v221_v41  ;;  %v227_v50 = vld [vmem:[%s1117_s1 + $0xf0] sm:$0xff]  ;;  %s714_s12 = sshll.u32 %s187_s7, 3  ;;  %s716_s11 = sshll.u32 %s1122_s8, 3 }
  0x10   : > { %v826_v48 = vpack.c.bf16 %v231_v44, %v228_v43  ;;  %v851_v49 = vpack.c.bf16 %v226_v46, %v223_v45  ;;  %v230_v51 = vld [vmem:[%s1117_s1 + $0x108] sm:$0xff]  ;;  %v237_v53 = vld [vmem:[%s1117_s1 + $0x140] sm:$0xff]  ;;  %v232_v55 = vld [vmem:[%s1117_s1 + $0x118] sm:$0xff]  ;;  %s189_s21 = scalar_lea.vmem %s1116_s0, %s714_s12  ;;  %s194_s14 = scalar_lea.vmem %s1120_s4, %s716_s11 }
  0x11   : > { %817 = vmatpush1.bf16.msra.mxu0 %v816_v29  ;;  %v234_v52 = vld [vmem:[%s1117_s1 + $0x128] sm:$0xff]  ;;  %v229_v54 = vld [vmem:[%s1117_s1 + $0x100] sm:$0xff]  ;;  %v828_v56 = vpack.c.bf16 %v230_v51, %v227_v50  ;;  %v236_v60 = vld [vmem:[%s1117_s1 + $0x138] sm:$0xff] }
  0x12   : > { %819 = vmatprep.subr.bf16.mxu0 %v818_v30  ;;  %846 = vmatpush3.bf16.msra.mxu1 %v845_v31  ;;  %v830_v57 = vpack.c.bf16 %v237_v53, %v234_v52  ;;  %v854_v58 = vpack.c.bf16 %v232_v55, %v229_v54  ;;  %v233_v59 = vld [vmem:[%s1117_s1 + $0x120] sm:$0xff]  ;;  %v240_v61 = vld [vmem:[%s1117_s1 + $0x158] sm:$0xff]  ;;  %v243_v62 = vld [vmem:[%s1117_s1 + $0x170] sm:$0xff] }
  0x13   : > { %847 = vmatprep.subr.bf16.mxu1 %v885_v5  ;;  %v235_v63 = vld [vmem:[%s1117_s1 + $0x130] sm:$0xff]  ;;  %v238_v0 = vld [vmem:[%s1117_s1 + $0x148] sm:$0xff]  ;;  %v832_v1 = vpack.c.bf16 %v236_v60, %v233_v59  ;;  %v834_v2 = vpack.c.bf16 %v243_v62, %v240_v61  ;;  %v241_v7 = vld [vmem:[%s1117_s1 + $0x160] sm:$0xff] }
  0x14   : > { %v857_v3 = vpack.c.bf16 %v238_v0, %v235_v63  ;;  %v239_v4 = vld [vmem:[%s1117_s1 + $0x150] sm:$0xff]  ;;  %v242_v6 = vld [vmem:[%s1117_s1 + $0x168] sm:$0xff]  ;;  %v244_v8 = vld [vmem:[%s1117_s1 + $0x178] sm:$0xff] }
  0x15   : > { %821 = vmatpush1.bf16.msra.mxu0 %v820_v38  ;;  %v836_v9 = vpack.c.bf16 %v242_v6, %v239_v4  ;;  %v860_v10 = vpack.c.bf16 %v244_v8, %v241_v7  ;;  %v196_v11 = vld [vmem:[%s189_s21] sm:$0xff]  ;;  %v717_v13 = vld [vmem:[%s1118_s2 + $0x10] sm:$0xff]  ;;  %v718_v19 = vld [vmem:[%s1118_s2 + $0x18] sm:$0xff] }
  0x16   : > { %823 = vmatprep.subr.bf16.mxu0 %v822_v39  ;;  %849 = vmatpush3.bf16.msra.mxu1 %v848_v40  ;;  %v386_v12 = vld [vmem:[%s1118_s2] sm:$0xff]  ;;  %v724_v20 = vld [vmem:[%s1118_s2 + $0x28] sm:$0xff] }
  0x17   : > { %850 = vmatprep.subr.bf16.mxu1 %v885_v5  ;;  %v723_v17 = vld [vmem:[%s1118_s2 + $0x20] sm:$0xff] }
  0x18   : > { %v727_v24 = vld [vmem:[%s1119_s3] ss:$0 sm:$0xff] }
  0x19   : > { %825 = vmatpush1.bf16.msra.mxu0 %v824_v47 }
  0x1a   : > { %827 = vmatprep.subr.bf16.mxu0 %v826_v48  ;;  %852 = vmatpush3.bf16.msra.mxu1 %v851_v49 }
  0x1b   : > { %853 = vmatprep.subr.bf16.mxu1 %v885_v5 }
  0x1d   : > { %829 = vmatpush1.bf16.msra.mxu0 %v828_v56 }
  0x1e   : > { %831 = vmatprep.subr.bf16.mxu0 %v830_v57  ;;  %855 = vmatpush3.bf16.msra.mxu1 %v854_v58 }
  0x1f   : > { %856 = vmatprep.subr.bf16.mxu1 %v885_v5 }
  0x21   : > { %833 = vmatpush1.bf16.msra.mxu0 %v832_v1 }
  0x22   : > { %835 = vmatprep.subr.bf16.mxu0 %v834_v2  ;;  %858 = vmatpush3.bf16.msra.mxu1 %v857_v3 }
  0x23   : > { %859 = vmatprep.subr.bf16.mxu1 %v885_v5  ;;  %v387_v5 = vld [vmem:[%s1118_s2 + $0x8] sm:$0xff] }
  0x25   : > { %837 = vmatpush1.bf16.msra.mxu0 %v836_v9 }
  0x26   : > { %861 = vmatpush3.bf16.msra.mxu1 %v860_v10 }
  0x28   : > { %310 = vmatmul.mubr.f32.vlgmr.msra.gmra.mrb[0].mxu0 %v196_v11 }
  0x29   : > { %789 = vmatmul.mubr.f32.vlgmr.msra.gmra.mrb[0].mxu1 %v196_v11  ;;  %798 = vmatprep.mubr.msk.f32.mxu0 %vm391_vm1, %v386_v12 }
  0x2a   : > { %793 = vmatprep.mubr.msk.f32.mxu1 %vm391_vm1, %v717_v13 }
  0xfb   : > { %v311_v14 = vpop.f32.mrb[0].mxu0 }
  0xfc   : > { %v313_v15 = vpop.f32.mrb[1].mxu0  ;;  %796 = vmatprep.subr.mxu0 %v311_v14  ;;  %v382_v16 = vpop.f32.mrb[0].mxu1 }
  0xfd   : > { %791 = vmatprep.subr.mxu1 %v313_v15  ;;  %797 = vmatpush3.msra.mxu0 %v311_v14  ;;  %v790_v18 = vpop.f32.mrb[1].mxu1 }
  0xfe   : > { %792 = vmatpush3.msra.mxu1 %v313_v15  ;;  %799 = vmatmul.mubr.msk.f32.vlgmr.msra.gmra.mrb[2].mxu0 %vm391_vm1, %v387_v5 }
  0xff   : > { %801 = vmatprep.subr.mxu0 %v382_v16  ;;  %803 = vmatprep.mubr.msk.f32.mxu0 %vm391_vm1, %v723_v17 }
 0x100   : > { %802 = vmatpush3.msra.mxu0 %v382_v16  ;;  %794 = vmatmul.mubr.msk.f32.vlgmr.msra.gmra.mrb[2].mxu1 %vm391_vm1, %v718_v19 }
 0x106   : > { %804 = vmatmul.mubr.msk.f32.vlgmr.msra.gmra.mrb[2].mxu0 %vm391_vm1, %v724_v20 }
 0x1d3   : > { %v795_v21 = vpop.f32.mrb[2].mxu1 }
 0x1d4   : > { %v464_v22 = vpop.f32.mrb[3].mxu1 }
 0x1d9   : > { %v805_v23 = vpop.f32.mrb[2].mxu0 }
 0x1da   : > { %v862_v25 = vadd.f32 %v805_v23, %v795_v21  ;;  %v629_v26 = vpop.f32.mrb[3].mxu0 }
 0x1db   : > { %v863_v27 = vadd.f32 %v629_v26, %v464_v22 }
 0x1dc   : > { %v648_v28 = vadd.f32 %v862_v25, %v727_v24 }
 0x1dd   : > { %v647_v29 = vadd.f32 %v863_v27, %v727_v24 }
 0x1de   : > { %v650_v31 = vmax.f32 %v648_v28, 0.0 }
 0x1df   : > { %v649_v30 = vmax.f32 %v647_v29, 0.0 }
 0x1e0   : > { %652 = vst [vmem:[%s194_s14 + $0x8] sm:$0xff] %v650_v31 }
 0x1e1   : > { %651 = vst [vmem:[%s194_s14] sm:$0xff] %v649_v30 }
 0x1e2 PF: > { %s14_s15 = sadd.s32 1, %s883_s15  }
 0x1e3   : > { %p11_p5 = scmp.ge.s32.totalorder %s14_s15, 4  }
 0x1e5   :  { %13 = sbr.rel (!%p11_p5) target bundleno = 1 (0x1), region = 68 }

</bundles_post_ra>
